<compile_context>
chip_gen: v7x
topology: tpu7x:2x2x1
jax: 0.10.0
libtpu: 0.0.40
codegen_flags: <defaults>
</compile_context>

<pallas_src>
import math

import jax
import jax.numpy as jnp
from jax.experimental import pallas as pl
from jax.experimental.pallas import tpu as pltpu


def _round_up(x: int, m: int) -> int:
    return ((x + m - 1) // m) * m


def _pick_tile(n_pad: int, cap: int, min_tiles: int = 1) -> int:
    """Largest tile in {1024,512,256,128} (<= cap) dividing n_pad with >= min_tiles tiles."""
    for t in (1024, 512, 256, 128):
        if t <= cap and n_pad % t == 0 and n_pad // t >= min_tiles:
            return t
    return 128


# ---------------------------------------------------------------------------
# Kernel 1: support = x @ W   (small matmul, row-tiled, weight fully resident)
# ---------------------------------------------------------------------------
def _support_kernel(x_ref, w_ref, s_ref):
    s_ref[...] = jnp.dot(
        x_ref[...], w_ref[...], preferred_element_type=jnp.float32
    ).astype(s_ref.dtype)


# ---------------------------------------------------------------------------
# Kernel 2: out = adj @ support + bias   (row x K tiled, f32 accumulation)
# ---------------------------------------------------------------------------
def _make_aggregate_kernel(resident_support: bool, use_scratch: bool):
    """Build the aggregation kernel.

    resident_support: support ref holds the full (N_pad, out_f_pad) array
                      (sliced per k in-kernel) instead of a per-k tile.
    use_scratch:      accumulate into a f32 VMEM scratch (needed when the
                      output dtype is narrower than f32); otherwise accumulate
                      directly into the resident output block.
    """

    def kernel(adj_ref, s_ref, b_ref, o_ref, *scratch):
        k = pl.program_id(1)
        nk = pl.num_programs(1)
        tk = adj_ref.shape[1]

        if resident_support:
            off = pl.multiple_of(k * tk, 128)
            s_blk = s_ref[pl.ds(off, tk), :]
        else:
            s_blk = s_ref[...]

        partial = jnp.dot(adj_ref[...], s_blk, preferred_element_type=jnp.float32)

        if use_scratch:
            acc_ref = scratch[0]

            @pl.when(k == 0)
            def _init():
                acc_ref[...] = jnp.zeros_like(acc_ref)

            acc_ref[...] += partial

            @pl.when(k == nk - 1)
            def _finalize():
                o_ref[...] = (acc_ref[...] + b_ref[...]).astype(o_ref.dtype)

        else:
            # Output block index ignores k -> the f32 output block is resident
            # across the reduction; accumulate into it directly (no scratch).
            @pl.when(k == 0)
            def _init():
                o_ref[...] = jnp.zeros_like(o_ref)

            o_ref[...] += partial

            @pl.when(k == nk - 1)
            def _finalize():
                o_ref[...] += b_ref[...]

    return kernel


def graph_convolution(
    x,
    adj,
    weight,
    bias=None,
    *,
    compute_dtype=jnp.bfloat16,
    block_m: int = 1024,
    block_k: int = 1024,
    vmem_limit_bytes: int = 48 * 1024 * 1024,  # safe on v7x (64 MiB physical)
):
    """Fused GCN layer forward: adj @ (x @ weight) + bias."""
    n, in_f = x.shape
    out_f = weight.shape[1]
    out_dtype = x.dtype
    comp_bytes = jnp.dtype(compute_dtype).itemsize
    out_item = jnp.dtype(out_dtype).itemsize

    # Lane-dense padding (multiples of 128 only — at most 127 extra elems/axis).
    n_pad = _round_up(n, 128)
    in_f_pad = _round_up(in_f, 128)
    out_f_pad = _round_up(out_f, 128)

    # Row tile: require >= 2 row tiles when possible (v7x megacore sharding).
    tm = _pick_tile(n_pad, block_m, min_tiles=2)
    tk = _pick_tile(n_pad, block_k, min_tiles=1)

    # ---- adj: zero-copy fast path whenever possible -------------------------
    if n == n_pad and adj.dtype == compute_dtype:
        adj_in = adj                                  # no wrapper copy at all
    elif n == n_pad:
        adj_in = adj.astype(compute_dtype)            # cast only (unavoidable)
    else:
        adj_in = (
            jnp.zeros((n_pad, n_pad), compute_dtype)
            .at[:n, :n]
            .set(adj.astype(compute_dtype))
        )

    # ---- small tensors: pad (cheap, O(N*in_f) / O(in_f*out_f)) --------------
    if (n, in_f) == (n_pad, in_f_pad):
        x_in = x
    else:
        x_in = jnp.zeros((n_pad, in_f_pad), x.dtype).at[:n, :in_f].set(x)
    w_in = (
        jnp.zeros((in_f_pad, out_f_pad), weight.dtype)
        .at[:in_f, :out_f]
        .set(weight)
    )
    if bias is None:
        b_in = jnp.zeros((1, out_f_pad), jnp.float32)
    else:
        b_in = (
            jnp.zeros((1, out_f_pad), jnp.float32)
            .at[0, :out_f]
            .set(bias.astype(jnp.float32))
        )

    # --- support = x @ W  (tiny: O(N * in_f * out_f)) -------------------------
    ts = _pick_tile(n_pad, 512, min_tiles=1)
    support = pl.pallas_call(
        _support_kernel,
        out_shape=jax.ShapeDtypeStruct((n_pad, out_f_pad), compute_dtype),
        grid_spec=pltpu.PrefetchScalarGridSpec(
            num_scalar_prefetch=0,
            grid=(n_pad // ts,),
            in_specs=[
                pl.BlockSpec((ts, in_f_pad), lambda i: (i, 0)),           # x rows
                pl.BlockSpec((in_f_pad, out_f_pad), lambda i: (0, 0)),    # W resident
            ],
            out_specs=pl.BlockSpec((ts, out_f_pad), lambda i: (i, 0)),
        ),
        compiler_params=pltpu.CompilerParams(
            dimension_semantics=("parallel",),
        ),
    )(x_in, w_in)

    # --- out = adj @ support + bias  (dominant: O(N^2 * out_f)) ---------------
    accumulate_in_out = jnp.dtype(out_dtype) == jnp.dtype(jnp.float32)
    acc_bytes = 0 if accumulate_in_out else tm * out_f_pad * 4

    # VMEM budget check for fully-resident support (double-buffered blocks).
    fixed_bytes = (
        2 * tm * tk * comp_bytes            # adj tiles (double-buffered)
        + 2 * tm * out_f_pad * out_item     # output blocks
        + acc_bytes                         # f32 scratch (if any)
        + 2 * out_f_pad * 4                 # bias
    )
    resident_bytes = 2 * n_pad * out_f_pad * comp_bytes
    resident_support = fixed_bytes + resident_bytes <= int(vmem_limit_bytes * 0.85)

    if resident_support:
        s_spec = pl.BlockSpec((n_pad, out_f_pad), lambda i, k: (0, 0))
        support_reads = 1
    else:
        s_spec = pl.BlockSpec((tk, out_f_pad), lambda i, k: (k, 0))
        support_reads = n_pad // tm

    kernel = _make_aggregate_kernel(resident_support, not accumulate_in_out)
    scratch = (
        [] if accumulate_in_out else [pltpu.VMEM((tm, out_f_pad), jnp.float32)]
    )

    flops = 2 * n_pad * n_pad * out_f_pad
    bytes_accessed = (
        n_pad * n_pad * comp_bytes                        # adj (read once)
        + support_reads * n_pad * out_f_pad * comp_bytes  # support
        + n_pad * out_f_pad * out_item                    # output
    )

    out_pad = pl.pallas_call(
        kernel,
        out_shape=jax.ShapeDtypeStruct((n_pad, out_f_pad), out_dtype),
        grid_spec=pltpu.PrefetchScalarGridSpec(
            num_scalar_prefetch=0,
            grid=(n_pad // tm, n_pad // tk),
            in_specs=[
                pl.BlockSpec((tm, tk), lambda i, k: (i, k)),           # adj tile
                s_spec,                                                # support
                pl.BlockSpec((1, out_f_pad), lambda i, k: (0, 0)),     # bias
            ],
            out_specs=pl.BlockSpec((tm, out_f_pad), lambda i, k: (i, 0)),
            scratch_shapes=scratch,
        ),
        compiler_params=pltpu.CompilerParams(
            dimension_semantics=("parallel", "arbitrary"),
            vmem_limit_bytes=vmem_limit_bytes,
        ),
        cost_estimate=pl.CostEstimate(
            flops=flops, transcendentals=0, bytes_accessed=bytes_accessed
        ),
    )(adj_in, support, b_in)

    return out_pad[:n, :out_f]


if __name__ == "__main__":
    # Small, module-consistent shapes. N=256 is 128-aligned (zero-copy adj
    # path, 2 row tiles); in_f=64 / out_f=48 exercise feature padding.
    N = 256
    IN_FEATURES = 64
    OUT_FEATURES = 48

    key = jax.random.PRNGKey(0)
    k_x, k_adj, k_w, k_b = jax.random.split(key, 4)

    # Deterministic parameter init mirroring reset_parameters():
    # uniform(-stdv, stdv) with stdv = 1/sqrt(out_features).
    stdv = 1.0 / math.sqrt(OUT_FEATURES)
    weight = jax.random.uniform(
        k_w, (IN_FEATURES, OUT_FEATURES), jnp.float32, minval=-stdv, maxval=stdv
    )
    bias = jax.random.uniform(
        k_b, (OUT_FEATURES,), jnp.float32, minval=-stdv, maxval=stdv
    )

    # Dense node features and a row-normalized adjacency.
    x = jax.random.normal(k_x, (N, IN_FEATURES), jnp.float32)
    adj_raw = (jax.random.uniform(k_adj, (N, N), jnp.float32) < 0.1).astype(
        jnp.float32
    ) + jnp.eye(N, dtype=jnp.float32)
    adj_f32 = adj_raw / jnp.sum(adj_raw, axis=1, keepdims=True)
    adj_bf16 = adj_f32.astype(jnp.bfloat16)  # adj stored in compute dtype upstream

    # Plain-JAX reference.
    ref = adj_f32 @ (x @ weight) + bias

    # 1) Default bf16 compute path; 128-aligned N + bf16 adj -> zero-copy adj,
    #    resident support, accumulate directly into the f32 output block.
    out_bf16 = jax.block_until_ready(graph_convolution(x, adj_bf16, weight, bias))
    assert out_bf16.shape == (N, OUT_FEATURES)
    assert jnp.allclose(out_bf16, ref, atol=5e-2, rtol=5e-2)

    # 2) f32 compute path with a non-128-aligned N (exercises the pad fallback).
    N2 = 192
    x2 = x[:N2]
    adj2 = adj_raw[:N2, :N2] / jnp.sum(adj_raw[:N2, :N2], axis=1, keepdims=True)
    ref2 = adj2 @ (x2 @ weight) + bias
    out_f32 = jax.block_until_ready(
        graph_convolution(x2, adj2, weight, bias, compute_dtype=jnp.float32)
    )
    assert out_f32.shape == (N2, OUT_FEATURES)
    assert jnp.allclose(out_f32, ref2, atol=1e-3, rtol=1e-3)

    # 3) bf16 activations -> bf16 output dtype (exercises the f32 scratch path).
    out_bf_act = jax.block_until_ready(
        graph_convolution(x.astype(jnp.bfloat16), adj_bf16, weight, bias)
    )
    assert out_bf_act.dtype == jnp.bfloat16
    assert jnp.allclose(out_bf_act.astype(jnp.float32), ref, atol=1e-1, rtol=1e-1)

    # 4) bias=None path (module's bias=False config).
    out_nb = jax.block_until_ready(graph_convolution(x, adj_bf16, weight, None))
    assert jnp.allclose(out_nb, ref - bias, atol=5e-2, rtol=5e-2)

    print("KERNEL_OK")
</pallas_src>

<mosaic_0001>
module attributes {stable_mosaic.version = 11 : i64} {
  func.func @_support_kernel(%arg0: i32, %arg1: memref<256x128xf32, #tpu.memory_space<vmem>>, %arg2: memref<128x128xf32, #tpu.memory_space<vmem>>, %arg3: memref<256x128xbf16, #tpu.memory_space<vmem>>) attributes {dimension_semantics = [#tpu.dimension_semantics<parallel>], iteration_bounds = array<i64: 1>, scalar_prefetch = 0 : i64, scratch_operands = 0 : i64, tpu.core_type = #tpu.core_type<tc>, window_params = [{transform_indices = @transform_0, window_bounds = array<i64: 256, 128>}, {pipeline_mode = #tpu.pipeline_mode<synchronous>, transform_indices = @transform_1, window_bounds = array<i64: 128, 128>}, {transform_indices = @transform_2, window_bounds = array<i64: 256, 128>}]} {
    %c0 = arith.constant 0 : index
    %c0_0 = arith.constant 0 : index
    %0 = vector.load %arg1[%c0, %c0_0] : memref<256x128xf32, #tpu.memory_space<vmem>>, vector<256x128xf32>
    %c0_1 = arith.constant 0 : index
    %c0_2 = arith.constant 0 : index
    %1 = vector.load %arg2[%c0_1, %c0_2] : memref<128x128xf32, #tpu.memory_space<vmem>>, vector<128x128xf32>
    %cst = arith.constant dense<0.000000e+00> : vector<256x128xf32>
    %2 = tpu.matmul %0, %1, %cst {dimension_numbers = #tpu.dot_dimension_numbers<[1], [0], [0], [1], [0, 0, 1, 1], [], []>} : vector<256x128xf32>, vector<128x128xf32>, vector<256x128xf32> -> vector<256x128xf32>
    %3 = arith.truncf %2 : vector<256x128xf32> to vector<256x128xbf16>
    %c0_3 = arith.constant 0 : index
    %c0_4 = arith.constant 0 : index
    %4 = vector.load %arg3[%c0_3, %c0_4] : memref<256x128xbf16, #tpu.memory_space<vmem>>, vector<256x128xbf16>
    tpu.vector_store %arg3[%c0_3, %c0_4], %3 {strides = array<i32>} : memref<256x128xbf16, #tpu.memory_space<vmem>>, vector<256x128xbf16>,
    return
  }
  func.func @transform_0(%arg0: i32) -> (i32, i32) {
    %c0_i32 = arith.constant 0 : i32
    %c0_i32_0 = arith.constant 0 : i32
    return %arg0, %c0_i32 : i32, i32
  }
  func.func @transform_1(%arg0: i32) -> (i32, i32) {
    %c0_i32 = arith.constant 0 : i32
    %c0_i32_0 = arith.constant 0 : i32
    %c0_i32_1 = arith.constant 0 : i32
    return %c0_i32, %c0_i32_0 : i32, i32
  }
  func.func @transform_2(%arg0: i32) -> (i32, i32) {
    %c0_i32 = arith.constant 0 : i32
    %c0_i32_0 = arith.constant 0 : i32
    return %arg0, %c0_i32 : i32, i32
  }
}

</mosaic_0001>

<bundles_post_ra>
// kernel: tpu_custom_call.1
= control target key start
LH: loop header
LB: loop body
LE: loop exit
PB: predicated region body
PF: predicated region fallthrough
CT: control target
= control target key end

     0   :  { %7 = vsyncpa [#allocation3], 0  ;;  %s963_s0 = inlined_call_operand.hbm [shape: f32[256,128], index: 0, kind: input, shape index: {}]   ;;  %s964_s1 = inlined_call_operand.hbm [shape: f32[128,128], index: 1, kind: input, shape index: {}]   ;;  %s965_s2 = inlined_call_operand.hbm [shape: bf16[256,128], index: 2, kind: output, shape index: {}]  }
   0x1   :  { %8 = vsyncpa [#allocation6], 0 }
   0x2   :  { %9 = vsyncpa [#allocation4], 0  ;;  %s905_s9 = smov [#allocation2]   ;;  %s833_s13 = scalar_lea.hbm %s963_s0, 4096 }
   0x3   :  { %s15_s10 = sshll.u32 %s905_s9, 4  ;;  %p834_p0 = scmp.ne.s32.totalorder %s963_s0, %s833_s13  ;;  %s16_s10 = int_to_ptr.vmem [resolvable:$true] %s15_s10 }
   0x4   :  { %p837_p1 = scmp.lt.u32.totalorder %s833_s13, %s963_s0 }
   0x6   :  { %p839_p2 = pnand %p837_p1, %p834_p0 }
   0x8   :  { %842 = shalt.err (!%p839_p2)
}
   0x9   :  { %s843_s18 = scalar_lea.vmem %s16_s10, 4096  ;;  %p848_p4 = scmp.lt.s32.totalorder %s16_s10, %s16_s10 }
   0xa   :  { %p844_p3 = scmp.ne.s32.totalorder %s16_s10, %s843_s18  ;;  %p849_p5 = scmp.lt.s32.totalorder %s843_s18, %s843_s18 }
   0xc   :  { %p850_p6 = por %p849_p5, %p848_p4 }
   0xe   :  { %p851_p7 = pnand %p850_p6, %p844_p3 }
  0x10   :  { %854 = shalt.err (!%p851_p7)
}
  0x11   :  { %s906_s19 = smov 128   ;;  %s907_s20 = smov 8  }
  0x12   :  { %21 = dma.hbm_to_vmem [thread:$0]  %s963_s0, 4096, %s16_s10, [#allocation3], %s906_s19, %s906_s19, %s907_s20  }
  0x13   :  { %s908_s23 = smov [#allocation5]   ;;  %s855_s27 = scalar_lea.hbm %s964_s1, 2048 }
  0x14   :  { %s27_s24 = sshll.u32 %s908_s23, 4  ;;  %p856_p8 = scmp.ne.s32.totalorder %s964_s1, %s855_s27  ;;  %s28_s24 = int_to_ptr.vmem [resolvable:$true] %s27_s24 }
  0x15   :  { %p859_p9 = scmp.lt.u32.totalorder %s855_s27, %s964_s1 }
  0x17   :  { %p861_p10 = pnand %p859_p9, %p856_p8 }
  0x19   :  { %864 = shalt.err (!%p861_p10)
}
  0x1a   :  { %s865_s4 = scalar_lea.vmem %s28_s24, 2048  ;;  %p870_p12 = scmp.lt.s32.totalorder %s28_s24, %s28_s24 }
  0x1b   :  { %p866_p11 = scmp.ne.s32.totalorder %s28_s24, %s865_s4  ;;  %p871_p13 = scmp.lt.s32.totalorder %s865_s4, %s865_s4 }
  0x1d   :  { %p872_p0 = por %p871_p13, %p870_p12 }
  0x1f   :  { %p873_p1 = pnand %p872_p0, %p866_p11 }
  0x21   :  { %876 = shalt.err (!%p873_p1)
}
  0x22   :  { %33 = dma.hbm_to_vmem [thread:$0]  %s964_s1, 2048, %s28_s24, [#allocation6], %s906_s19, %s906_s19, %s907_s20  }
  0x23   :  { %899 = dma.done.wait [#allocation3], 4096  }
  0x24   :  { %900 = vsyncadd [#allocation3], 4294963200 }
  0x25   :  { %901 = dma.done.wait [#allocation6], 2048  }
  0x26   :  { %902 = vsyncadd [#allocation6], 4294965248  ;;  %v72_v0 = vld [vmem:[#allocation5] sm:$0xff]  ;;  %v73_v1 = vld [vmem:[#allocation5 + $0x8] sm:$0xff]  ;;  %s909_s1 = smov [#allocation7]  }
  0x27   :  { %v74_v2 = vld [vmem:[#allocation5 + $0x10] sm:$0xff]  ;;  %v778_v3 = vpack.c.bf16 %v73_v1, %v72_v0  ;;  %v75_v4 = vld [vmem:[#allocation5 + $0x18] sm:$0xff]  ;;  %v76_v6 = vld [vmem:[#allocation5 + $0x20] sm:$0xff]  ;;  %s478_s6 = sshll.u32 %s909_s1, 4  ;;  %s479_s6 = int_to_ptr.vmem [resolvable:$true] %s478_s6 }
  0x28   :  { %v782_v5 = vpack.c.bf16 %v75_v4, %v74_v2  ;;  %v77_v7 = vld [vmem:[#allocation5 + $0x28] sm:$0xff]  ;;  %v40_v9 = vld [vmem:[#allocation2] sm:$0xff]  ;;  %v78_v11 = vld [vmem:[#allocation5 + $0x30] sm:$0xff]  ;;  %s877_s7 = scalar_lea.vmem %s479_s6, 2048  ;;  %p882_p3 = scmp.lt.s32.totalorder %s479_s6, %s479_s6 }
  0x29   :  { %779 = vmatprep.subr.bf16.mxu0 %v778_v3  ;;  %810 = vmatprep.subr.bf16.mxu1 %v778_v3  ;;  %v786_v8 = vpack.c.bf16 %v77_v7, %v76_v6  ;;  %v56_v10 = vld [vmem:[#allocation2 + $0x80] sm:$0xff]  ;;  %v79_v12 = vld [vmem:[#allocation5 + $0x38] sm:$0xff]  ;;  %v81_v15 = vld [vmem:[#allocation5 + $0x48] sm:$0xff]  ;;  %p878_p2 = scmp.ne.s32.totalorder %s479_s6, %s877_s7  ;;  %p883_p4 = scmp.lt.s32.totalorder %s877_s7, %s877_s7 }
  0x2a   :  { %781 = vmatpush3.bf16.msra.mxu0 %v778_v3  ;;  %818 = vmatpush3.bf16.msra.mxu1 %v778_v3  ;;  %v790_v13 = vpack.c.bf16 %v79_v12, %v78_v11  ;;  %v80_v14 = vld [vmem:[#allocation5 + $0x40] sm:$0xff]  ;;  %v82_v17 = vld [vmem:[#allocation5 + $0x50] sm:$0xff]  ;;  %v83_v18 = vld [vmem:[#allocation5 + $0x58] sm:$0xff] }
  0x2b   :  { %783 = vmatprep.subr.bf16.mxu0 %v782_v5  ;;  %811 = vmatprep.subr.bf16.mxu1 %v782_v5  ;;  %v794_v16 = vpack.c.bf16 %v81_v15, %v80_v14  ;;  %v798_v19 = vpack.c.bf16 %v83_v18, %v82_v17  ;;  %v84_v20 = vld [vmem:[#allocation5 + $0x60] sm:$0xff]  ;;  %v85_v21 = vld [vmem:[#allocation5 + $0x68] sm:$0xff]  ;;  %v86_v23 = vld [vmem:[#allocation5 + $0x70] sm:$0xff]  ;;  %p884_p5 = por %p883_p4, %p882_p3 }
  0x2c   :  { %730 = vmatprep.mubr.f32.mxu0 %v40_v9  ;;  %754 = vmatprep.mubr.f32.mxu1 %v56_v10  ;;  %v802_v22 = vpack.c.bf16 %v85_v21, %v84_v20  ;;  %v87_v24 = vld [vmem:[#allocation5 + $0x78] sm:$0xff]  ;;  %v41_v26 = vld [vmem:[#allocation2 + $0x8] sm:$0xff]  ;;  %v42_v28 = vld [vmem:[#allocation2 + $0x10] sm:$0xff] }
  0x2d   :  { %v806_v25 = vpack.c.bf16 %v87_v24, %v86_v23  ;;  %v57_v27 = vld [vmem:[#allocation2 + $0x88] sm:$0xff]  ;;  %v58_v29 = vld [vmem:[#allocation2 + $0x90] sm:$0xff]  ;;  %v43_v30 = vld [vmem:[#allocation2 + $0x18] sm:$0xff]  ;;  %p885_p6 = pnand %p884_p5, %p878_p2 }
  0x2e   :  { %785 = vmatpush3.bf16.msra.mxu0 %v782_v5  ;;  %819 = vmatpush3.bf16.msra.mxu1 %v782_v5  ;;  %v59_v31 = vld [vmem:[#allocation2 + $0x98] sm:$0xff]  ;;  %v44_v32 = vld [vmem:[#allocation2 + $0x20] sm:$0xff]  ;;  %v45_v34 = vld [vmem:[#allocation2 + $0x28] sm:$0xff] }
  0x2f   :  { %787 = vmatprep.subr.bf16.mxu0 %v786_v8  ;;  %812 = vmatprep.subr.bf16.mxu1 %v786_v8  ;;  %v60_v33 = vld [vmem:[#allocation2 + $0xa0] sm:$0xff]  ;;  %v61_v35 = vld [vmem:[#allocation2 + $0xa8] sm:$0xff]  ;;  %v46_v36 = vld [vmem:[#allocation2 + $0x30] sm:$0xff] }
  0x30   :  { %v62_v37 = vld [vmem:[#allocation2 + $0xb0] sm:$0xff]  ;;  %v47_v38 = vld [vmem:[#allocation2 + $0x38] sm:$0xff]  ;;  %v48_v40 = vld [vmem:[#allocation2 + $0x40] sm:$0xff] }
  0x31   :  { %v63_v39 = vld [vmem:[#allocation2 + $0xb8] sm:$0xff]  ;;  %v64_v41 = vld [vmem:[#allocation2 + $0xc0] sm:$0xff]  ;;  %v49_v42 = vld [vmem:[#allocation2 + $0x48] sm:$0xff] }
  0x32   :  { %789 = vmatpush3.bf16.msra.mxu0 %v786_v8  ;;  %820 = vmatpush3.bf16.msra.mxu1 %v786_v8  ;;  %v65_v43 = vld [vmem:[#allocation2 + $0xc8] sm:$0xff]  ;;  %v50_v44 = vld [vmem:[#allocation2 + $0x50] sm:$0xff]  ;;  %v51_v46 = vld [vmem:[#allocation2 + $0x58] sm:$0xff] }
  0x33   :  { %791 = vmatprep.subr.bf16.mxu0 %v790_v13  ;;  %813 = vmatprep.subr.bf16.mxu1 %v790_v13  ;;  %v66_v45 = vld [vmem:[#allocation2 + $0xd0] sm:$0xff]  ;;  %v67_v47 = vld [vmem:[#allocation2 + $0xd8] sm:$0xff]  ;;  %v52_v48 = vld [vmem:[#allocation2 + $0x60] sm:$0xff] }
  0x34   :  { %v68_v49 = vld [vmem:[#allocation2 + $0xe0] sm:$0xff]  ;;  %v53_v50 = vld [vmem:[#allocation2 + $0x68] sm:$0xff]  ;;  %v54_v52 = vld [vmem:[#allocation2 + $0x70] sm:$0xff] }
  0x35   :  { %v69_v51 = vld [vmem:[#allocation2 + $0xe8] sm:$0xff]  ;;  %v70_v53 = vld [vmem:[#allocation2 + $0xf0] sm:$0xff]  ;;  %v55_v54 = vld [vmem:[#allocation2 + $0x78] sm:$0xff] }
  0x36   :  { %793 = vmatpush3.bf16.msra.mxu0 %v790_v13  ;;  %821 = vmatpush3.bf16.msra.mxu1 %v790_v13  ;;  %v71_v55 = vld [vmem:[#allocation2 + $0xf8] sm:$0xff] }
  0x37   :  { %795 = vmatprep.subr.bf16.mxu0 %v794_v16  ;;  %814 = vmatprep.subr.bf16.mxu1 %v794_v16 }
  0x3a   :  { %797 = vmatpush3.bf16.msra.mxu0 %v794_v16  ;;  %822 = vmatpush3.bf16.msra.mxu1 %v794_v16 }
  0x3b   :  { %799 = vmatprep.subr.bf16.mxu0 %v798_v19  ;;  %815 = vmatprep.subr.bf16.mxu1 %v798_v19 }
  0x3e   :  { %801 = vmatpush3.bf16.msra.mxu0 %v798_v19  ;;  %823 = vmatpush3.bf16.msra.mxu1 %v798_v19 }
  0x3f   :  { %803 = vmatprep.subr.bf16.mxu0 %v802_v22  ;;  %816 = vmatprep.subr.bf16.mxu1 %v802_v22 }
  0x42   :  { %805 = vmatpush3.bf16.msra.mxu0 %v802_v22  ;;  %824 = vmatpush3.bf16.msra.mxu1 %v802_v22 }
  0x43   :  { %807 = vmatprep.subr.bf16.mxu0 %v806_v25  ;;  %817 = vmatprep.subr.bf16.mxu1 %v806_v25 }
  0x46   :  { %809 = vmatpush3.bf16.msra.mxu0 %v806_v25  ;;  %825 = vmatpush3.bf16.msra.mxu1 %v806_v25 }
  0x49   :  { %731 = vmatmul.mubr.f32.vlgmr.msra.gmra.mrb[0].mxu0 %v41_v26  ;;  %755 = vmatmul.mubr.f32.vlgmr.msra.gmra.mrb[0].mxu1 %v57_v27 }
  0x4a   :  { %733 = vmatprep.mubr.f32.mxu0 %v42_v28  ;;  %757 = vmatprep.mubr.f32.mxu1 %v58_v29 }
  0x4d   :  { %734 = vmatmul.mubr.f32.gmra.mrb[2].mxu0 %v43_v30  ;;  %758 = vmatmul.mubr.f32.gmra.mrb[2].mxu1 %v59_v31 }
  0x4e   :  { %736 = vmatprep.mubr.f32.mxu0 %v44_v32  ;;  %760 = vmatprep.mubr.f32.mxu1 %v60_v33 }
  0x51   :  { %737 = vmatmul.mubr.f32.gmra.mrb[4].mxu0 %v45_v34  ;;  %761 = vmatmul.mubr.f32.gmra.mrb[4].mxu1 %v61_v35 }
  0x52   :  { %739 = vmatprep.mubr.f32.mxu0 %v46_v36  ;;  %763 = vmatprep.mubr.f32.mxu1 %v62_v37 }
  0x55   :  { %740 = vmatmul.mubr.f32.gmra.mrb[6].mxu0 %v47_v38  ;;  %764 = vmatmul.mubr.f32.gmra.mrb[6].mxu1 %v63_v39 }
  0x56   :  { %742 = vmatprep.mubr.f32.mxu0 %v48_v40  ;;  %766 = vmatprep.mubr.f32.mxu1 %v64_v41 }
  0x59   :  { %743 = vmatmul.mubr.f32.gmra.mrb[8].mxu0 %v49_v42  ;;  %767 = vmatmul.mubr.f32.gmra.mrb[8].mxu1 %v65_v43 }
  0x5a   :  { %745 = vmatprep.mubr.f32.mxu0 %v50_v44  ;;  %769 = vmatprep.mubr.f32.mxu1 %v66_v45 }
  0x5d   :  { %746 = vmatmul.mubr.f32.gmra.mrb[10].mxu0 %v51_v46  ;;  %770 = vmatmul.mubr.f32.gmra.mrb[10].mxu1 %v67_v47 }
  0x5e   :  { %748 = vmatprep.mubr.f32.mxu0 %v52_v48  ;;  %772 = vmatprep.mubr.f32.mxu1 %v68_v49 }
  0x61   :  { %749 = vmatmul.mubr.f32.gmra.mrb[12].mxu0 %v53_v50  ;;  %773 = vmatmul.mubr.f32.gmra.mrb[12].mxu1 %v69_v51 }
  0x62   :  { %751 = vmatprep.mubr.f32.mxu0 %v54_v52  ;;  %775 = vmatprep.mubr.f32.mxu1 %v70_v53 }
  0x65   :  { %752 = vmatmul.mubr.f32.gmra.mrb[14].mxu0 %v55_v54  ;;  %776 = vmatmul.mubr.f32.gmra.mrb[14].mxu1 %v71_v55 }
 0x11c   :  { %v732_v56 = vpop.f32.mrb[0].mxu0  ;;  %v756_v57 = vpop.f32.mrb[0].mxu1 }
 0x11d   :  { %v154_v58 = vpop.f32.mrb[1].mxu0  ;;  %v234_v59 = vpop.f32.mrb[1].mxu1 }
 0x11e   :  { %v558_v60 = vpack.c.bf16 %v732_v56, %v154_v58  ;;  %v598_v61 = vpack.c.bf16 %v756_v57, %v234_v59 }
 0x120   :  { %559 = vst [vmem:[#allocation7] sm:$0xff] %v558_v60   ;;  %642 = vst [vmem:[#allocation7 + $0x40] sm:$0xff] %v598_v61   ;;  %v735_v62 = vpop.f32.mrb[2].mxu0  ;;  %v759_v63 = vpop.f32.mrb[2].mxu1 }
 0x121   :  { %v164_v0 = vpop.f32.mrb[3].mxu0  ;;  %v244_v1 = vpop.f32.mrb[3].mxu1 }
 0x122   :  { %v563_v2 = vpack.c.bf16 %v735_v62, %v164_v0  ;;  %v603_v3 = vpack.c.bf16 %v759_v63, %v244_v1 }
 0x124   :  { %635 = vst [vmem:[#allocation7 + $0x8] sm:$0xff] %v563_v2   ;;  %643 = vst [vmem:[#allocation7 + $0x48] sm:$0xff] %v603_v3   ;;  %v738_v4 = vpop.f32.mrb[4].mxu0  ;;  %v762_v5 = vpop.f32.mrb[4].mxu1 }
 0x125   :  { %v174_v6 = vpop.f32.mrb[5].mxu0  ;;  %v254_v7 = vpop.f32.mrb[5].mxu1 }
 0x126   :  { %v568_v8 = vpack.c.bf16 %v738_v4, %v174_v6  ;;  %v608_v9 = vpack.c.bf16 %v762_v5, %v254_v7 }
 0x128   :  { %636 = vst [vmem:[#allocation7 + $0x10] sm:$0xff] %v568_v8   ;;  %644 = vst [vmem:[#allocation7 + $0x50] sm:$0xff] %v608_v9   ;;  %v741_v10 = vpop.f32.mrb[6].mxu0  ;;  %v765_v11 = vpop.f32.mrb[6].mxu1 }
 0x129   :  { %v184_v12 = vpop.f32.mrb[7].mxu0  ;;  %v264_v13 = vpop.f32.mrb[7].mxu1 }
 0x12a   :  { %v573_v14 = vpack.c.bf16 %v741_v10, %v184_v12  ;;  %v613_v15 = vpack.c.bf16 %v765_v11, %v264_v13 }
 0x12c   :  { %637 = vst [vmem:[#allocation7 + $0x18] sm:$0xff] %v573_v14   ;;  %645 = vst [vmem:[#allocation7 + $0x58] sm:$0xff] %v613_v15   ;;  %v744_v16 = vpop.f32.mrb[8].mxu0  ;;  %v768_v17 = vpop.f32.mrb[8].mxu1 }
 0x12d   :  { %v194_v18 = vpop.f32.mrb[9].mxu0  ;;  %v274_v19 = vpop.f32.mrb[9].mxu1 }
 0x12e   :  { %v578_v20 = vpack.c.bf16 %v744_v16, %v194_v18  ;;  %v618_v21 = vpack.c.bf16 %v768_v17, %v274_v19 }
 0x130   :  { %638 = vst [vmem:[#allocation7 + $0x20] sm:$0xff] %v578_v20   ;;  %646 = vst [vmem:[#allocation7 + $0x60] sm:$0xff] %v618_v21   ;;  %v747_v22 = vpop.f32.mrb[10].mxu0  ;;  %v771_v23 = vpop.f32.mrb[10].mxu1 }
 0x131   :  { %v204_v24 = vpop.f32.mrb[11].mxu0  ;;  %v284_v25 = vpop.f32.mrb[11].mxu1 }
 0x132   :  { %v583_v26 = vpack.c.bf16 %v747_v22, %v204_v24  ;;  %v623_v27 = vpack.c.bf16 %v771_v23, %v284_v25 }
 0x134   :  { %639 = vst [vmem:[#allocation7 + $0x28] sm:$0xff] %v583_v26   ;;  %647 = vst [vmem:[#allocation7 + $0x68] sm:$0xff] %v623_v27   ;;  %v750_v28 = vpop.f32.mrb[12].mxu0  ;;  %v774_v29 = vpop.f32.mrb[12].mxu1 }
 0x135   :  { %v214_v30 = vpop.f32.mrb[13].mxu0  ;;  %v294_v31 = vpop.f32.mrb[13].mxu1 }
 0x136   :  { %v588_v32 = vpack.c.bf16 %v750_v28, %v214_v30  ;;  %v628_v33 = vpack.c.bf16 %v774_v29, %v294_v31 }
 0x138   :  { %640 = vst [vmem:[#allocation7 + $0x30] sm:$0xff] %v588_v32   ;;  %648 = vst [vmem:[#allocation7 + $0x70] sm:$0xff] %v628_v33   ;;  %v753_v34 = vpop.f32.mrb[14].mxu0  ;;  %v777_v35 = vpop.f32.mrb[14].mxu1 }
 0x139   :  { %v224_v36 = vpop.f32.mrb[15].mxu0  ;;  %v304_v37 = vpop.f32.mrb[15].mxu1 }
 0x13a   :  { %v593_v38 = vpack.c.bf16 %v753_v34, %v224_v36  ;;  %v633_v39 = vpack.c.bf16 %v777_v35, %v304_v37 }
 0x13c   :  { %641 = vst [vmem:[#allocation7 + $0x38] sm:$0xff] %v593_v38   ;;  %649 = vst [vmem:[#allocation7 + $0x78] sm:$0xff] %v633_v39  }
 0x13d   :  { %888 = shalt.err (!%p885_p6)
}
 0x13e   :  { %s889_s10 = scalar_lea.hbm %s965_s2, 2048 }
 0x13f   :  { %p890_p7 = scmp.ne.s32.totalorder %s965_s2, %s889_s10  ;;  %p893_p8 = scmp.lt.u32.totalorder %s889_s10, %s965_s2 }
 0x141   :  { %p895_p9 = pnand %p893_p8, %p890_p7 }
 0x143   :  { %898 = shalt.err (!%p895_p9)
}
 0x144   :  { %s910_s15 = smov 64   ;;  %s911_s16 = smov 4  }
 0x145   :  { %484 = dma.vmem_to_hbm [thread:$0]  %s479_s6, 2048, %s965_s2, [#allocation4], %s910_s15, %s910_s15, %s911_s16  }
 0x146   :  { %903 = dma.done.wait [#allocation4], 2048  }
 0x147   :  { %904 = vsyncadd [#allocation4], 4294965248 }
 0x148   :  { %488 = vsyncpa [#allocation3], 1 }
 0x149   :  { %489 = vsyncpa [#allocation6], 1 }
 0x14a   :  { %490 = vsyncpa [#allocation4], 1 }

</bundles_post_ra>
